<compile_context>
chip_gen: v7x
topology: tpu7x:2x2x1
jax: 0.10.0
libtpu: 0.0.40
codegen_flags: <defaults>
</compile_context>

<pallas_src>
import numpy as np
import jax
import jax.numpy as jnp
from jax.experimental import pallas as pl
from jax.experimental.pallas import tpu as pltpu


def _round_up(x, m):
    return ((x + m - 1) // m) * m


def _default_pack():
    """Batch-packing factor: 4 samples per MXU row on the 256-wide-MXU parts
    (v6e / v7x), 2 on the 128-wide parts (v5e and older).  Misdetection falls
    back to 2, which is correct (and near-neutral) everywhere."""
    try:
        kind = jax.devices()[0].device_kind.lower()
    except Exception:
        return 2
    return 4 if any(t in kind for t in ("v6", "v7", "7x", "trillium")) else 2


# ----------------------------- parameter glue -------------------------------

def conv_transpose_matrix(w, hi, wi, stride, pad):
    """Dense matrix M s.t. flat_out = flat_in @ M reproduces ConvTranspose2d.

    w: (Cin, Cout, K, K) PyTorch ConvTranspose2d weight; flat layouts are
    row-major over (C, H, W)."""
    ci, co, k, _ = w.shape
    ho = (hi - 1) * stride - 2 * pad + k
    wo = (wi - 1) * stride - 2 * pad + k
    m = np.zeros((ci * hi * wi, co * ho * wo), dtype=np.float32)
    for c_in in range(ci):
        for ih in range(hi):
            for iw in range(wi):
                row = (c_in * hi + ih) * wi + iw
                for c_out in range(co):
                    for kh in range(k):
                        for kw in range(k):
                            oh = ih * stride - pad + kh
                            ow = iw * stride - pad + kw
                            if 0 <= oh < ho and 0 <= ow < wo:
                                col = (c_out * ho + oh) * wo + ow
                                m[row, col] += w[c_in, c_out, kh, kw]
    return m, ho, wo


def bn_scale_shift(gamma, beta, mean, var, eps, extra_bias, spatial):
    """Fold eval-mode BatchNorm (+ optional preceding conv bias) into
    per-position scale/shift vectors over the flattened (C*H*W) axis."""
    inv_std = 1.0 / np.sqrt(var + eps)
    scale_c = gamma * inv_std
    bias = extra_bias if extra_bias is not None else np.zeros_like(mean)
    shift_c = (bias - mean) * scale_c + beta
    scale = np.repeat(scale_c, spatial).astype(np.float32)
    shift = np.repeat(shift_c, spatial).astype(np.float32)
    return scale[None, :], shift[None, :]


def _block_diag(m, k):
    r, c = m.shape
    out = np.zeros((k * r, k * c), dtype=m.dtype)
    for i in range(k):
        out[i * r:(i + 1) * r, i * c:(i + 1) * c] = m
    return out


def build_params(w1, w2, b2, w3, b3, g1, be1, mu1, var1, g2, be2, mu2, var2,
                 eps, side, pack=None):
    """Lower the conv stack to (matmul + shift) form; fold BN scales into the
    matrices; build `pack`-way block-diagonal bf16 weights (pack samples per
    MXU row, lane-dense output with no dead columns)."""
    if pack is None:
        pack = _default_pack()

    m1, h1o, w1o = conv_transpose_matrix(w1, 1, 1, stride=1, pad=0)      # (32, 64)
    m2, h2o, w2o = conv_transpose_matrix(w2, h1o, w1o, stride=2, pad=1)  # (64, 128)
    m3, h3o, w3o = conv_transpose_matrix(w3, h2o, w2o, stride=2, pad=1)  # (128, 64)
    assert (h3o, w3o) == (side, side)

    sc1, sh1 = bn_scale_shift(g1, be1, mu1, var1, eps, None, h1o * w1o)
    sc2, sh2 = bn_scale_shift(g2, be2, mu2, var2, eps, b2, h2o * w2o)
    m1f = m1 * sc1                                   # fold BN scale column-wise
    m2f = m2 * sc2
    b3r = np.repeat(b3, h3o * w3o).astype(np.float32)[None, :]   # (1, 64)

    # Packed output columns must be 128-aligned so stores are lane-dense.
    assert (pack * side * side) % 128 == 0, "pack*side*side must be 128-aligned"

    m1bd = _block_diag(m1f, pack)                    # (pack*32,  pack*64)
    m2bd = _block_diag(m2f, pack)                    # (pack*64,  pack*128)
    m3bd = _block_diag(m3, pack)                     # (pack*128, pack*64)
    sh1p = np.tile(sh1, (1, pack))
    sh2p = np.tile(sh2, (1, pack))
    b3p = np.tile(b3r, (1, pack))

    # Weights in bf16 (single-pass MXU anyway); shifts stay f32 (f32 VPU math).
    return (jnp.asarray(m1bd, dtype=jnp.bfloat16),
            jnp.asarray(sh1p, dtype=jnp.float32),
            jnp.asarray(m2bd, dtype=jnp.bfloat16),
            jnp.asarray(sh2p, dtype=jnp.float32),
            jnp.asarray(m3bd, dtype=jnp.bfloat16),
            jnp.asarray(b3p, dtype=jnp.float32),
            side, pack)


# ------------------------------- Pallas kernel -------------------------------

def generator_kernel(x_ref, m1_ref, sh1_ref, m2_ref, sh2_ref, m3_ref, b3_ref,
                     out_ref):
    # LHS is cast to bf16 at each MXU input; accumulation and the add/ReLU
    # elementwise work stay f32 (v5e VPU has no bf16 datapath).
    x = x_ref[...].astype(jnp.bfloat16)
    # ConvTranspose2d(32->16,k2,s1,p0), BN scale folded into m1; + shift, ReLU
    h1 = jnp.dot(x, m1_ref[...], preferred_element_type=jnp.float32)
    h1 = jnp.maximum(h1 + sh1_ref[...], 0.0)
    # ConvTranspose2d(16->8,k4,s2,p1), BN scale folded into m2; + shift, ReLU
    h2 = jnp.dot(h1.astype(jnp.bfloat16), m2_ref[...],
                 preferred_element_type=jnp.float32)
    h2 = jnp.maximum(h2 + sh2_ref[...], 0.0)
    # ConvTranspose2d(8->1,k4,s2,p1) + bias; output row = `pack` samples,
    # pack*64 lanes -> lane-dense store, no dead columns.
    out_ref[...] = jnp.dot(h2.astype(jnp.bfloat16), m3_ref[...],
                           preferred_element_type=jnp.float32) + b3_ref[...]


_MIN_TILE_P = 16        # packed-row tile granularity (sublane-friendly)
_MAX_TILE_ROWS = 8192   # default max batch rows per grid step


def generator_forward(x_nchw, params, max_tile_rows=_MAX_TILE_ROWS):
    """x_nchw: (N, random_dim, 1, 1) -> (N, 1, side, side) float32."""
    m1, sh1, m2, sh2, m3, b3, side, pack = params
    n = x_nchw.shape[0]
    in_cols = m1.shape[0]              # pack * random_dim
    in_dim = in_cols // pack
    out_cols = m3.shape[1]             # pack * side * side
    out_dim = side * side

    # ---- grid over packed rows (pack samples per row) -----------------------
    n_p = pl.cdiv(n, pack)
    max_tile_p = max(_MIN_TILE_P,
                     _round_up(pl.cdiv(max(int(max_tile_rows), 1), pack),
                               _MIN_TILE_P))
    n_steps = pl.cdiv(n_p, max_tile_p)
    if n_p >= 2 * _MIN_TILE_P:
        n_steps = max(n_steps, 2)      # >=2 steps -> megacore sharding on v7x
    tile_p = _round_up(pl.cdiv(n_p, n_steps), _MIN_TILE_P)   # bound padding waste
    n_steps = pl.cdiv(n_p, tile_p)
    n_p_pad = n_steps * tile_p
    n_rows_pad = n_p_pad * pack

    x2d = x_nchw.reshape(n, in_dim)
    if n_rows_pad != n:
        x2d = jnp.pad(x2d, ((0, n_rows_pad - n), (0, 0)))
    xp = x2d.reshape(n_p_pad, in_cols)     # free row-major reshape: pack samples/row

    flops = 2 * n_p_pad * (m1.shape[0] * m1.shape[1]
                           + m2.shape[0] * m2.shape[1]
                           + m3.shape[0] * m3.shape[1])
    bytes_accessed = int(
        xp.size * xp.dtype.itemsize + n_p_pad * out_cols * 4
        + sum(int(a.size) * a.dtype.itemsize for a in (m1, sh1, m2, sh2, m3, b3)))

    out = pl.pallas_call(
        generator_kernel,
        out_shape=jax.ShapeDtypeStruct((n_p_pad, out_cols), jnp.float32),
        grid=(n_steps,),
        in_specs=[
            pl.BlockSpec((tile_p, in_cols), lambda i: (i, 0)),   # batch-streamed
            pl.BlockSpec(m1.shape, lambda i: (0, 0)),            # resident weights
            pl.BlockSpec(sh1.shape, lambda i: (0, 0)),
            pl.BlockSpec(m2.shape, lambda i: (0, 0)),
            pl.BlockSpec(sh2.shape, lambda i: (0, 0)),
            pl.BlockSpec(m3.shape, lambda i: (0, 0)),
            pl.BlockSpec(b3.shape, lambda i: (0, 0)),
        ],
        out_specs=pl.BlockSpec((tile_p, out_cols), lambda i: (i, 0)),
        compiler_params=pltpu.CompilerParams(
            dimension_semantics=("parallel",),
            vmem_limit_bytes=32 * 1024 * 1024),
        cost_estimate=pl.CostEstimate(
            flops=flops, transcendentals=0, bytes_accessed=bytes_accessed),
    )(xp, m1, sh1, m2, sh2, m3, b3)

    # Unpack: (n_p_pad, pack*64) -> (n_rows_pad, 64) is a free row-major
    # reshape (no dead columns); slice only when batch padding was added.
    out_rows = out.reshape(n_rows_pad, out_dim)
    if n_rows_pad != n:
        out_rows = out_rows[:n]
    return out_rows.reshape(n, 1, side, side)


# ------------------------------ numpy reference ------------------------------

def conv_transpose_ref(x, w, bias, stride, pad):
    n, ci, hi, wi = x.shape
    _, co, k, _ = w.shape
    ho = (hi - 1) * stride - 2 * pad + k
    wo = (wi - 1) * stride - 2 * pad + k
    out = np.zeros((n, co, ho, wo), dtype=np.float64)
    for c_in in range(ci):
        for ih in range(hi):
            for iw in range(wi):
                v = x[:, c_in, ih, iw]
                for c_out in range(co):
                    for kh in range(k):
                        for kw in range(k):
                            oh = ih * stride - pad + kh
                            ow = iw * stride - pad + kw
                            if 0 <= oh < ho and 0 <= ow < wo:
                                out[:, c_out, oh, ow] += v * w[c_in, c_out, kh, kw]
    if bias is not None:
        out += bias[None, :, None, None]
    return out


def bn_relu_ref(x, gamma, beta, mean, var, eps):
    y = (x - mean[None, :, None, None]) / np.sqrt(var[None, :, None, None] + eps)
    y = y * gamma[None, :, None, None] + beta[None, :, None, None]
    return np.maximum(y, 0.0)


# ----------------------------------- main ------------------------------------

if __name__ == "__main__":
    side, random_dim, num_channels = 8, 32, 8
    batch = 101          # deliberately odd: exercises pack padding + row padding
    eps = 1e-5
    rng = np.random.RandomState(0)

    # ConvTranspose2d weights (Cin, Cout, K, K), deterministic.
    w1 = (0.1 * rng.randn(random_dim, 16, 2, 2)).astype(np.float32)   # no bias
    w2 = (0.1 * rng.randn(16, 8, 4, 4)).astype(np.float32)
    b2 = (0.1 * rng.randn(8)).astype(np.float32)
    w3 = (0.1 * rng.randn(8, 1, 4, 4)).astype(np.float32)
    b3 = (0.1 * rng.randn(1)).astype(np.float32)

    # BatchNorm2d params (eval mode).
    g1 = (1.0 + 0.1 * rng.randn(16)).astype(np.float32)
    be1 = (0.1 * rng.randn(16)).astype(np.float32)
    mu1 = (0.1 * rng.randn(16)).astype(np.float32)
    var1 = (0.5 + rng.rand(16)).astype(np.float32)

    g2 = (1.0 + 0.1 * rng.randn(8)).astype(np.float32)
    be2 = (0.1 * rng.randn(8)).astype(np.float32)
    mu2 = (0.1 * rng.randn(8)).astype(np.float32)
    var2 = (0.5 + rng.rand(8)).astype(np.float32)

    # Input noise, deterministic.
    x = jax.random.normal(jax.random.PRNGKey(0), (batch, random_dim, 1, 1),
                          dtype=jnp.float32)

    # numpy f64 reference of the same forward pass (independent of the lowering).
    x_np = np.asarray(x, dtype=np.float64)
    r = conv_transpose_ref(x_np, w1, None, stride=1, pad=0)
    r = bn_relu_ref(r, g1, be1, mu1, var1, eps)
    r = conv_transpose_ref(r, w2, b2, stride=2, pad=1)
    r = bn_relu_ref(r, g2, be2, mu2, var2, eps)
    ref = conv_transpose_ref(r, w3, b3, stride=2, pad=1)

    # Test the chip-auto pack factor (None -> 4 on v6e/v7x, 2 on v5e) plus the
    # other factor, each with the default tiling and a small multi-step grid.
    auto_pack = _default_pack()
    other_pack = 2 if auto_pack == 4 else 4
    for pack in (None, other_pack):
        params = build_params(w1, w2, b2, w3, b3, g1, be1, mu1, var1,
                              g2, be2, mu2, var2, eps, side, pack=pack)
        out = jax.block_until_ready(generator_forward(x, params))
        out_multi = jax.block_until_ready(
            generator_forward(x, params, max_tile_rows=16))
        assert out.shape == (batch, 1, side, side)
        # bf16 operands + single-pass MXU (f32 accumulate): ~1e-2-class abs error
        # vs the f64 reference, accepted per perf review.
        np.testing.assert_allclose(np.asarray(out), ref, rtol=2e-2, atol=5e-2)
        np.testing.assert_allclose(np.asarray(out_multi), ref, rtol=2e-2, atol=5e-2)

    print("KERNEL_OK")
</pallas_src>

<mosaic_0001>
module attributes {stable_mosaic.version = 11 : i64} {
  func.func @generator_kernel(%arg0: i32, %arg1: memref<32x64xf32, #tpu.memory_space<vmem>>, %arg2: memref<64x128xbf16, #tpu.memory_space<vmem>>, %arg3: memref<1x128xf32, #tpu.memory_space<vmem>>, %arg4: memref<128x256xbf16, #tpu.memory_space<vmem>>, %arg5: memref<1x256xf32, #tpu.memory_space<vmem>>, %arg6: memref<256x128xbf16, #tpu.memory_space<vmem>>, %arg7: memref<1x128xf32, #tpu.memory_space<vmem>>, %arg8: memref<32x128xf32, #tpu.memory_space<vmem>>) attributes {dimension_semantics = [#tpu.dimension_semantics<parallel>], iteration_bounds = array<i64: 2>, scalar_prefetch = 0 : i64, scratch_operands = 0 : i64, tpu.core_type = #tpu.core_type<tc>, window_params = [{transform_indices = @transform_0, window_bounds = array<i64: 32, 64>}, {pipeline_mode = #tpu.pipeline_mode<synchronous>, transform_indices = @transform_1, window_bounds = array<i64: 64, 128>}, {pipeline_mode = #tpu.pipeline_mode<synchronous>, transform_indices = @transform_2, window_bounds = array<i64: 1, 128>}, {pipeline_mode = #tpu.pipeline_mode<synchronous>, transform_indices = @transform_3, window_bounds = array<i64: 128, 256>}, {pipeline_mode = #tpu.pipeline_mode<synchronous>, transform_indices = @transform_4, window_bounds = array<i64: 1, 256>}, {pipeline_mode = #tpu.pipeline_mode<synchronous>, transform_indices = @transform_5, window_bounds = array<i64: 256, 128>}, {pipeline_mode = #tpu.pipeline_mode<synchronous>, transform_indices = @transform_6, window_bounds = array<i64: 1, 128>}, {transform_indices = @transform_7, window_bounds = array<i64: 32, 128>}]} {
    %c0 = arith.constant 0 : index
    %c0_0 = arith.constant 0 : index
    %0 = vector.load %arg1[%c0, %c0_0] : memref<32x64xf32, #tpu.memory_space<vmem>>, vector<32x64xf32>
    %1 = arith.truncf %0 : vector<32x64xf32> to vector<32x64xbf16>
    %c0_1 = arith.constant 0 : index
    %c0_2 = arith.constant 0 : index
    %2 = vector.load %arg2[%c0_1, %c0_2] : memref<64x128xbf16, #tpu.memory_space<vmem>>, vector<64x128xbf16>
    %cst = arith.constant dense<0.000000e+00> : vector<32x128xf32>
    %3 = tpu.matmul %1, %2, %cst {dimension_numbers = #tpu.dot_dimension_numbers<[1], [0], [0], [1], [0, 0, 1, 1], [], []>} : vector<32x64xbf16>, vector<64x128xbf16>, vector<32x128xf32> -> vector<32x128xf32>
    %c0_3 = arith.constant 0 : index
    %c0_4 = arith.constant 0 : index
    %4 = vector.load %arg3[%c0_3, %c0_4] : memref<1x128xf32, #tpu.memory_space<vmem>>, vector<1x128xf32>
    %5 = vector.broadcast %4 : vector<1x128xf32> to vector<32x128xf32>
    %6 = arith.addf %3, %5 : vector<32x128xf32>
    %cst_5 = arith.constant 0.000000e+00 : f32
    %7 = vector.broadcast %cst_5 : f32 to vector<32x128xf32>
    %8 = arith.maximumf %6, %7 : vector<32x128xf32>
    %9 = arith.truncf %8 : vector<32x128xf32> to vector<32x128xbf16>
    %c0_6 = arith.constant 0 : index
    %c0_7 = arith.constant 0 : index
    %10 = vector.load %arg4[%c0_6, %c0_7] : memref<128x256xbf16, #tpu.memory_space<vmem>>, vector<128x256xbf16>
    %cst_8 = arith.constant dense<0.000000e+00> : vector<32x256xf32>
    %11 = tpu.matmul %9, %10, %cst_8 {dimension_numbers = #tpu.dot_dimension_numbers<[1], [0], [0], [1], [0, 0, 1, 1], [], []>} : vector<32x128xbf16>, vector<128x256xbf16>, vector<32x256xf32> -> vector<32x256xf32>
    %c0_9 = arith.constant 0 : index
    %c0_10 = arith.constant 0 : index
    %12 = vector.load %arg5[%c0_9, %c0_10] : memref<1x256xf32, #tpu.memory_space<vmem>>, vector<1x256xf32>
    %13 = vector.broadcast %12 : vector<1x256xf32> to vector<32x256xf32>
    %14 = arith.addf %11, %13 : vector<32x256xf32>
    %cst_11 = arith.constant 0.000000e+00 : f32
    %15 = vector.broadcast %cst_11 : f32 to vector<32x256xf32>
    %16 = arith.maximumf %14, %15 : vector<32x256xf32>
    %17 = arith.truncf %16 : vector<32x256xf32> to vector<32x256xbf16>
    %c0_12 = arith.constant 0 : index
    %c0_13 = arith.constant 0 : index
    %18 = vector.load %arg6[%c0_12, %c0_13] : memref<256x128xbf16, #tpu.memory_space<vmem>>, vector<256x128xbf16>
    %cst_14 = arith.constant dense<0.000000e+00> : vector<32x128xf32>
    %19 = tpu.matmul %17, %18, %cst_14 {dimension_numbers = #tpu.dot_dimension_numbers<[1], [0], [0], [1], [0, 0, 1, 1], [], []>} : vector<32x256xbf16>, vector<256x128xbf16>, vector<32x128xf32> -> vector<32x128xf32>
    %c0_15 = arith.constant 0 : index
    %c0_16 = arith.constant 0 : index
    %20 = vector.load %arg7[%c0_15, %c0_16] : memref<1x128xf32, #tpu.memory_space<vmem>>, vector<1x128xf32>
    %21 = vector.broadcast %20 : vector<1x128xf32> to vector<32x128xf32>
    %22 = arith.addf %19, %21 : vector<32x128xf32>
    %c0_17 = arith.constant 0 : index
    %c0_18 = arith.constant 0 : index
    %23 = vector.load %arg8[%c0_17, %c0_18] : memref<32x128xf32, #tpu.memory_space<vmem>>, vector<32x128xf32>
    tpu.vector_store %arg8[%c0_17, %c0_18], %22 {strides = array<i32>} : memref<32x128xf32, #tpu.memory_space<vmem>>, vector<32x128xf32>,
    return
  }
  func.func @transform_0(%arg0: i32) -> (i32, i32) {
    %c0_i32 = arith.constant 0 : i32
    %c0_i32_0 = arith.constant 0 : i32
    return %arg0, %c0_i32 : i32, i32
  }
  func.func @transform_1(%arg0: i32) -> (i32, i32) {
    %c0_i32 = arith.constant 0 : i32
    %c0_i32_0 = arith.constant 0 : i32
    %c0_i32_1 = arith.constant 0 : i32
    return %c0_i32, %c0_i32_0 : i32, i32
  }
  func.func @transform_2(%arg0: i32) -> (i32, i32) {
    %c0_i32 = arith.constant 0 : i32
    %c0_i32_0 = arith.constant 0 : i32
    %c0_i32_1 = arith.constant 0 : i32
    return %c0_i32, %c0_i32_0 : i32, i32
  }
  func.func @transform_3(%arg0: i32) -> (i32, i32) {
    %c0_i32 = arith.constant 0 : i32
    %c0_i32_0 = arith.constant 0 : i32
    %c0_i32_1 = arith.constant 0 : i32
    return %c0_i32, %c0_i32_0 : i32, i32
  }
  func.func @transform_4(%arg0: i32) -> (i32, i32) {
    %c0_i32 = arith.constant 0 : i32
    %c0_i32_0 = arith.constant 0 : i32
    %c0_i32_1 = arith.constant 0 : i32
    return %c0_i32, %c0_i32_0 : i32, i32
  }
  func.func @transform_5(%arg0: i32) -> (i32, i32) {
    %c0_i32 = arith.constant 0 : i32
    %c0_i32_0 = arith.constant 0 : i32
    %c0_i32_1 = arith.constant 0 : i32
    return %c0_i32, %c0_i32_0 : i32, i32
  }
  func.func @transform_6(%arg0: i32) -> (i32, i32) {
    %c0_i32 = arith.constant 0 : i32
    %c0_i32_0 = arith.constant 0 : i32
    %c0_i32_1 = arith.constant 0 : i32
    return %c0_i32, %c0_i32_0 : i32, i32
  }
  func.func @transform_7(%arg0: i32) -> (i32, i32) {
    %c0_i32 = arith.constant 0 : i32
    %c0_i32_0 = arith.constant 0 : i32
    return %arg0, %c0_i32 : i32, i32
  }
}

</mosaic_0001>

<bundles_post_ra>
// kernel: tpu_custom_call.1
= control target key start
LH: loop header
LB: loop body
LE: loop exit
PB: predicated region body
PF: predicated region fallthrough
CT: control target
= control target key end

     0   :  { %s1695_s0 = inlined_call_operand.hbm [shape: f32[64,64], index: 0, kind: input, shape index: {}]   ;;  %s1696_s1 = inlined_call_operand.hbm [shape: bf16[64,128], index: 1, kind: input, shape index: {}]   ;;  %s1697_s2 = inlined_call_operand.vmem [shape: f32[1,128], index: 2, kind: input, shape index: {}]   ;;  %s1698_s3 = inlined_call_operand.hbm [shape: bf16[128,256], index: 3, kind: input, shape index: {}]   ;;  %s1699_s4 = inlined_call_operand.vmem [shape: f32[1,256], index: 4, kind: input, shape index: {}]   ;;  %s1700_s5 = inlined_call_operand.hbm [shape: bf16[256,128], index: 5, kind: input, shape index: {}]   ;;  %s1701_s6 = inlined_call_operand.vmem [shape: f32[1,128], index: 6, kind: input, shape index: {}]   ;;  %s1702_s7 = inlined_call_operand.hbm [shape: f32[64,128], index: 7, kind: output, shape index: {}]  }
   0x1   :  { %1709 = sst [smem:[#allocation16_spill]] %s1696_s1 }
   0x2   :  { %12 = vsyncpa [#allocation3], 0 }
   0x3   :  { %14 = vsyncpa [#allocation3 + $0x1], 0 }
   0x4   :  { %15 = vsyncpa [#allocation6], 0 }
   0x5   :  { %16 = vsyncpa [#allocation9], 0 }
   0x6   :  { %17 = vsyncpa [#allocation4], 0 }
   0x7   :  { %19 = vsyncpa [#allocation4 + $0x1], 0  ;;  %s1406_s24 = smov 0   ;;  %s1408_s25 = smov 0  }
   0x8   :  { %s1410_s26 = smov 0   ;;  %s1412_s27 = smov 0  }
   0x9 LB: > { %s1427_s28 = sadd.s32 4294967295, %s1352_s27   ;;  %s928_s29 = sadd.s32 4294967294, %s1352_s27   ;;  %s1352_s27 = sphi %s1412_s27, %s1734_s27   ;;  %s1348_s26 = sphi %s1410_s26, %s1733_s26   ;;  %s1344_s25 = sphi %s1408_s25, %s1732_s25   ;;  %s1340_s24 = sphi %s1406_s24, %s1731_s24  }
   0xa   : > { %p45_p0 = scmp.ne.s32.totalorder %s1344_s25, %s1340_s24  ;;  %p1703_p1 = scmp.eq.s32.totalorder %s1427_s28, 0 }
   0xb   : > { %p201_p3 = scmp.eq.s32.totalorder %s928_s29, 1  ;;  %p929_p5 = scmp.ge.s32.totalorder %s1352_s27, 1 }
   0xc   : > { %p1436_p4 = por %p1703_p1, %p45_p0  ;;  %p208_p7 = scmp.lt.s32.totalorder %s1352_s27, 3 }
   0xd   : > { %p1441_p6 = por %p201_p3, %p45_p0  ;;  %s1354_s10 = smov [#allocation5]  }
   0xe   : > { %s1710_s30 = scalar_select %p1436_p4, 1, 0 }
   0xf   : > { %s1711_s8 = scalar_select %p1441_p6, 1, 0 }
  0x10   : > { %p1446_p8 = pnand %p929_p5, %p208_p7  ;;  %s220_s11 = sshll.u32 %s1354_s10, 4  ;;  %s1450_s11 = int_to_ptr.vmem [resolvable:$true] %s220_s11 }
  0x11   : > { %1712 = sst [smem:[#allocation15_spill]] %s1711_s8  ;;  %s1355_s13 = smov [#allocation7]  }
  0x12   : > { %s1713_s9 = scalar_select %p1446_p8, 1, 0 }
  0x13   : > { %p1052_p9 = pneg %p1446_p8  ;;  %s236_s14 = sshll.u32 %s1355_s13, 4  ;;  %s1461_s14 = int_to_ptr.vmem [resolvable:$true] %s236_s14 }
  0x14   : > { %s1715_s1 = sld [smem:[#allocation16_spill]] }
  0x15   : > { %p1457_p11 = pnand %p1052_p9, %p1703_p1 }
  0x17   : > { %p1471_p13 = pneg %p1457_p11 }
  0x1a   : > { %s1164_s17 = scalar_lea.hbm %s1715_s1, 512 }
  0x1b   : > { %p1165_p12 = scmp.ne.s32.totalorder %s1715_s1, %s1164_s17  ;;  %p1171_p5 = scmp.lt.u32.totalorder %s1164_s17, %s1715_s1 }
  0x1d   : > { %p1167_p0 = pnand %p1471_p13, %p1165_p12 }
  0x1f   : > { %p1168_p3 = pneg %p1167_p0 }
  0x21   : > { %p1173_p7 = pnand %p1171_p5, %p1168_p3 }
  0x23   : > { %1176 = shalt.err (!%p1173_p7)
}
  0x24   : > { %s1177_s23 = scalar_lea.vmem %s1450_s11, 512  ;;  %p1185_p2 = scmp.lt.s32.totalorder %s1450_s11, %s1450_s11 }
  0x25   : > { %p1178_p9 = scmp.ne.s32.totalorder %s1450_s11, %s1177_s23  ;;  %p1186_p6 = scmp.lt.s32.totalorder %s1177_s23, %s1177_s23 }
  0x27   : > { %p1180_p10 = pnand %p1178_p9, %p1471_p13  ;;  %p1187_p12 = por %p1186_p6, %p1185_p2 }
  0x29   : > { %p1181_p1 = pneg %p1180_p10 }
  0x2b   : > { %p1188_p0 = pnand %p1187_p12, %p1181_p1 }
  0x2d   : > { %1191 = shalt.err (!%p1188_p0)
}
  0x2e   : > { %s1704_s29 = smov 64   ;;  %s1705_s10 = smov 4  }
  0x2f   : > { %1055 = dma.hbm_to_vmem [thread:$0]  (!%p1457_p11), %s1715_s1, 512, %s1450_s11, [#allocation6], %s1704_s29, %s1704_s29, %s1705_s10  }
  0x30   : > { %s1192_s18 = scalar_lea.hbm %s1698_s3, 2048 }
  0x31   : > { %p1193_p1 = scmp.ne.s32.totalorder %s1698_s3, %s1192_s18  ;;  %p1199_p10 = scmp.lt.u32.totalorder %s1192_s18, %s1698_s3 }
  0x33   : > { %p1195_p2 = pnand %p1193_p1, %p1471_p13 }
  0x35   : > { %p1196_p6 = pneg %p1195_p2 }
  0x37   : > { %p1201_p3 = pnand %p1199_p10, %p1196_p6 }
  0x39   : > { %1204 = shalt.err (!%p1201_p3)
}
  0x3a   : > { %s1205_s11 = scalar_lea.vmem %s1461_s14, 2048  ;;  %p1213_p12 = scmp.lt.s32.totalorder %s1461_s14, %s1461_s14 }
  0x3b   : > { %p1206_p5 = scmp.ne.s32.totalorder %s1461_s14, %s1205_s11  ;;  %p1214_p0 = scmp.lt.s32.totalorder %s1205_s11, %s1205_s11 }
  0x3d   : > { %p1208_p7 = pnand %p1206_p5, %p1471_p13  ;;  %p1215_p1 = por %p1214_p0, %p1213_p12 }
  0x3f   : > { %p1209_p9 = pneg %p1208_p7 }
  0x41   : > { %p1216_p2 = pnand %p1215_p1, %p1209_p9 }
  0x43   : > { %1219 = shalt.err (!%p1216_p2)
}
  0x44   : > { %s1358_s13 = smov 128   ;;  %s1359_s15 = smov 8  }
  0x45   : > { %1058 = dma.hbm_to_vmem [thread:$0]  (!%p1457_p11), %s1698_s3, 2048, %s1461_s14, [#allocation6], %s1358_s13, %s1358_s13, %s1359_s15  }
  0x46   : > { %s1360_s18 = smov [#allocation8]   ;;  %s1522_s21 = sadd.s32 1, %s1352_s27  }
  0x47   : > { %s252_s19 = sshll.u32 %s1360_s18, 4  ;;  %s1220_s11 = scalar_lea.hbm %s1700_s5, 2048  ;;  %s253_s19 = int_to_ptr.vmem [resolvable:$true] %s252_s19 }
  0x48   : > { %p1221_p6 = scmp.ne.s32.totalorder %s1700_s5, %s1220_s11  ;;  %p1227_p5 = scmp.lt.u32.totalorder %s1220_s11, %s1700_s5 }
  0x4a   : > { %p1223_p10 = pnand %p1221_p6, %p1471_p13 }
  0x4c   : > { %p1224_p3 = pneg %p1223_p10 }
  0x4e   : > { %p1229_p7 = pnand %p1227_p5, %p1224_p3 }
  0x50   : > { %1232 = shalt.err (!%p1229_p7)
}
  0x51   : > { %s1233_s14 = scalar_lea.vmem %s253_s19, 2048  ;;  %p1241_p1 = scmp.lt.s32.totalorder %s253_s19, %s253_s19 }
  0x52   : > { %p1234_p9 = scmp.ne.s32.totalorder %s253_s19, %s1233_s14  ;;  %p1242_p2 = scmp.lt.s32.totalorder %s1233_s14, %s1233_s14 }
  0x54   : > { %p1236_p12 = pnand %p1234_p9, %p1471_p13  ;;  %p1243_p4 = por %p1242_p2, %p1241_p1 }
  0x56   : > { %p1237_p0 = pneg %p1236_p12 }
  0x58   : > { %p1244_p8 = pnand %p1243_p4, %p1237_p0 }
  0x5a   : > { %1247 = shalt.err (!%p1244_p8)
}
  0x5b   : > { %s1717_s29 = smov 4   ;;  %s1718_s10 = smov 64  }
  0x5c   : > { %1061 = dma.hbm_to_vmem [thread:$0]  (!%p1457_p11), %s1700_s5, 2048, %s253_s19, [#allocation9], %s1718_s10, %s1718_s10, %s1717_s29  }
  0x5d   : > { %s29_s20 = ssub.s32 %s1352_s27, %s1522_s21  ;;  %s32_s12 = sadd.s32 1, %s1348_s26 }
  0x5e   : > { %p30_p4 = scmp.eq.s32.totalorder %s29_s20, 0  ;;  %p39_p8 = scmp.ne.s32.totalorder %s1348_s26, %s1344_s25 }
  0x5f   : > { %p40_p13 = scmp.eq.s32.totalorder %s1352_s27, 0  ;;  %p1073_p6 = scmp.lt.s32.totalorder %s1352_s27, 2 }
  0x60   : > { %s1553_s16 = scalar_select %p30_p4, %s1348_s26, %s32_s12  }
  0x61   : > { %p41_p10 = por %p40_p13, %p39_p8  ;;  %p1719_p3 = scmp.eq.s32.totalorder %s1427_s28, 1 }
  0x62   : > { %s269_s18 = sand.u32 1, %s1348_s26   ;;  %s988_s22 = sshll.u32 %s1352_s27, 9 }
  0x63   : > { %p1557_p5 = por %p1719_p3, %p39_p8  ;;  %s934_s23 = sshll.u32 %s269_s18, 5 }
  0x64   : > { %s1566_s19 = scalar_lea.hbm %s1695_s0, %s988_s22  ;;  %s273_s29 = scalar_lea.vmem [#allocation2], %s934_s23 }
  0x65   : > { %s280_s10 = sshll.u32 %s273_s29, 4  ;;  %p1568_p11 = pnand %p1073_p6, %p41_p10  ;;  %s1572_s10 = int_to_ptr.vmem [resolvable:$true] %s280_s10 }
  0x66   : > { %s1574_s8 = scalar_lea.sflag [#allocation3], %s269_s18  ;;  %s1248_s20 = scalar_lea.hbm %s1566_s19, 512 }
  0x67   : > { %p1249_p7 = scmp.ne.s32.totalorder %s1566_s19, %s1248_s20  ;;  %p1250_p9 = pneg %p1568_p11 }
  0x68   : > { %s1253_s23 = scalar_lea.hbm %s1695_s0, 1024  ;;  %p1254_p1 = scmp.lt.u32.totalorder %s1566_s19, %s1695_s0 }
  0x69   : > { %p1251_p12 = pnand %p1250_p9, %p1249_p7  ;;  %p1255_p2 = scmp.lt.u32.totalorder %s1253_s23, %s1248_s20 }
  0x6a   : > { %p1257_p8 = scmp.lt.u32.totalorder %s1248_s20, %s1566_s19 }
  0x6b   : > { %p1252_p0 = pneg %p1251_p12  ;;  %p1256_p4 = por %p1255_p2, %p1254_p1 }
  0x6d   : > { %p1258_p13 = por %p1257_p8, %p1256_p4 }
  0x6f   : > { %p1259_p6 = pnand %p1258_p13, %p1252_p0 }
  0x71   : > { %1262 = shalt.err (!%p1259_p6)
}
  0x72   : > { %s1263_s18 = scalar_lea.vmem %s1572_s10, 512  ;;  %s1361_s29 = smov [#allocation2]  }
  0x73   : > { %p1264_p10 = scmp.ne.s32.totalorder %s1572_s10, %s1263_s18  ;;  %s1268_s12 = sshll.u32 %s1361_s29, 4  ;;  %s1269_s12 = int_to_ptr.vmem [resolvable:$false] %s1268_s12 }
  0x74   : > { %s1270_s22 = scalar_lea.vmem %s1269_s12, 1024  ;;  %p1271_p12 = scmp.lt.s32.totalorder %s1572_s10, %s1269_s12 }
  0x75   : > { %p1266_p3 = pnand %p1264_p10, %p1250_p9  ;;  %p1272_p1 = scmp.lt.s32.totalorder %s1270_s22, %s1263_s18 }
  0x77   : > { %p1267_p7 = pneg %p1266_p3  ;;  %p1273_p2 = por %p1272_p1, %p1271_p12 }
  0x79   : > { %p1274_p4 = pnand %p1273_p2, %p1267_p7 }
  0x7b   : > { %1277 = shalt.err (!%p1274_p4)
}
  0x7c   : > { %1065 = dma.hbm_to_vmem [thread:$0]  (!%p1568_p11), %s1566_s19, 512, %s1572_s10, %s1574_s8, %s1358_s13, %s1358_s13, %s1359_s15  }
  0x7d   : > { %p1722_p9 = scmp.ne.s32.totalorder %s1713_s9, 0 }
  0x7e   : > { %s1608_s20 = sand.u32 (!%p1722_p9), 1, %s1344_s25   ;;  %p1723_p0 = scmp.ne.s32.totalorder (!%p1722_p9), %s1710_s30, 0 }
  0x7f   : > { %292 = sbr.rel (%p1722_p9) target bundleno = 844 (0x34c), region = 48  ;;  %s938_s23 = sshll.u32 (!%p1722_p9), %s1608_s20, 5 }
  0x80   : > { %s295_s11 = scalar_lea.sflag (!%p1722_p9), [#allocation3], %s1608_s20  ;;  %s1614_s1 = scalar_lea.vmem (!%p1722_p9), [#allocation2], %s938_s23 }
  0x86   : > { %1323 = dma.done.wait (%p1723_p0), %s295_s11, 512  }
  0x87   : > { %1325 = vsyncadd (%p1723_p0), %s295_s11, 4294966784  ;;  %p1724_p11 = scmp.eq.s32.totalorder %s1427_s28, 0 }
  0x89   : > { %1327 = dma.done.wait (%p1724_p11), [#allocation6], 2560   ;;  %p1725_p8 = pmov %p1724_p11 }
  0x8b   : > { %1329 = vsyncadd (%p1725_p8), [#allocation6], 4294964736  ;;  %p1726_p13 = pmov %p1725_p8 }
  0x8c   : > { %p1727_p6 = pmov %p1725_p8 }
  0x8d   : > { %1331 = dma.done.wait (%p1726_p13), [#allocation9], 2048  }
  0x8e   : > { %1333 = vsyncadd (%p1727_p6), [#allocation9], 4294965248  ;;  %v1120_v0 = vld [vmem:[#allocation5] sm:$0xff]   ;;  %v1121_v1 = vld [vmem:[#allocation5 + $0x8] sm:$0xff]   ;;  %vm389_vm0 = vcmask 523264   ;;  %v1362_v26 = vmov 0   ;;  %v469_v58 = vlaneseq }
  0x8f   : > { %1024 = vmatprep.subr.bf16.mxu0 %v1120_v0  ;;  %v1122_v2 = vld [vmem:[#allocation5 + $0x10] sm:$0xff]   ;;  %v344_v3 = vld [vmem:[%s1614_s1] sm:$0xff]  ;;  %v345_v4 = vld [vmem:[%s1614_s1 + $0x8] sm:$0xff]  ;;  %591 = vmatprep.mubr.bf16.mxu1 %v1362_v26  ;;  %s340_s8 = scalar_lea.vmem [#allocation10], %s938_s23  ;;  %s989_s18 = sshll.u32 %s1427_s28, 9 }
  0x90   : > { %1025 = vmatpush3.bf16.msra.mxu0 %v1120_v0  ;;  %v348_v5 = vpack.c.bf16 %v345_v4, %v344_v3  ;;  %v1124_v6 = vld [vmem:[#allocation7 + $0x4] ss:$8 sps:$4 sm:$0xff]   ;;  %v1126_v7 = vld [vmem:[#allocation7] ss:$8 sps:$4 sm:$0xff]   ;;  %v1127_v8 = vld [vmem:[#allocation7 + $0x14] ss:$8 sps:$4 sm:$0xff]   ;;  %s1651_s22 = scalar_lea.hbm %s1702_s7, %s989_s18 }
  0x91   : > { %1026 = vmatprep.subr.bf16.mxu0 %v1121_v1  ;;  %v1123_v9 = vld [vmem:[#allocation5 + $0x18] sm:$0xff]   ;;  %559 = vmatprep.subr.bf16.mxu1 %v1124_v6  ;;  %v1130_v11 = vld [vmem:[#allocation7 + $0x24] ss:$8 sps:$4 sm:$0xff]   ;;  %v346_v12 = vld [vmem:[%s1614_s1 + $0x10] sm:$0xff]  ;;  %v470_v59 = vshrl.u32 %v469_v58, 7  ;;  %s826_s14 = sshll.u32 %s340_s8, 4  ;;  %s1646_s14 = int_to_ptr.vmem [resolvable:$true] %s826_s14 }
  0x92   : > { %1032 = vmatprep.mubr.msk.bf16.mxu0 %vm389_vm0, %v348_v5  ;;  %560 = vmatpush1.bf16.msra.mxu1 %v1126_v7  ;;  %v1129_v10 = vld [vmem:[#allocation7 + $0x10] ss:$8 sps:$4 sm:$0xff]   ;;  %v1132_v14 = vld [vmem:[#allocation7 + $0x20] ss:$8 sps:$4 sm:$0xff]   ;;  %v1133_v15 = vld [vmem:[#allocation7 + $0x34] ss:$8 sps:$4 sm:$0xff]  }
  0x93   : > { %561 = vmatprep.subr.bf16.mxu1 %v1127_v8  ;;  %v347_v13 = vld [vmem:[%s1614_s1 + $0x18] sm:$0xff]  ;;  %v1136_v18 = vld [vmem:[#allocation7 + $0x44] ss:$8 sps:$4 sm:$0xff]   ;;  %v1138_v19 = vld [vmem:[#allocation7 + $0x40] ss:$8 sps:$4 sm:$0xff]   ;;  %v471_v60 = vsub.s32 0, %v470_v59 }
  0x94   : > { %1027 = vmatpush3.bf16.msra.mxu0 %v1121_v1  ;;  %v349_v16 = vpack.c.bf16 %v347_v13, %v346_v12  ;;  %v1135_v17 = vld [vmem:[#allocation7 + $0x30] ss:$8 sps:$4 sm:$0xff]   ;;  %v1139_v20 = vld [vmem:[#allocation7 + $0x54] ss:$8 sps:$4 sm:$0xff]   ;;  %v1142_v22 = vld [vmem:[#allocation7 + $0x64] ss:$8 sps:$4 sm:$0xff]  }
  0x95   : > { %1028 = vmatprep.subr.bf16.mxu0 %v1122_v2  ;;  %v1141_v21 = vld [vmem:[#allocation7 + $0x50] ss:$8 sps:$4 sm:$0xff]   ;;  %v1144_v23 = vld [vmem:[#allocation7 + $0x60] ss:$8 sps:$4 sm:$0xff]   ;;  %v1145_v24 = vld [vmem:[#allocation7 + $0x74] ss:$8 sps:$4 sm:$0xff]  }
  0x96   : > { %562 = vmatpush1.bf16.msra.mxu1 %v1129_v10  ;;  %v1147_v25 = vld [vmem:[#allocation7 + $0x70] ss:$8 sps:$4 sm:$0xff]   ;;  %v1148_v27 = vld [vmem:[#allocation8 + $0x40] sm:$0xff]   ;;  %v1150_v29 = vld [vmem:[#allocation8 + $0x48] sm:$0xff]   ;;  %v475_v62 = vsub.s32 1, %v470_v59  ;;  %s813_s23 = scalar_lea.sflag [#allocation4], %s1608_s20 }
  0x97   : > { %563 = vmatprep.subr.bf16.mxu1 %v1130_v11  ;;  %v1149_v28 = vld [vmem:[#allocation8] sm:$0xff]   ;;  %v1151_v30 = vld [vmem:[#allocation8 + $0x8] sm:$0xff]   ;;  %v1152_v31 = vld [vmem:[#allocation8 + $0x50] sm:$0xff]   ;;  %s1278_s11 = scalar_lea.vmem %s1646_s14, 512  ;;  %s1363_s28 = smov [#allocation10]  }
  0x98   : > { %1029 = vmatpush3.bf16.msra.mxu0 %v1122_v2  ;;  %v1153_v32 = vld [vmem:[#allocation8 + $0x10] sm:$0xff]   ;;  %v1154_v33 = vld [vmem:[#allocation8 + $0x58] sm:$0xff]   ;;  %v1156_v35 = vld [vmem:[#allocation8 + $0x60] sm:$0xff]   ;;  %p1279_p10 = scmp.ne.s32.totalorder %s1646_s14, %s1278_s11  ;;  %s1282_s1 = sshll.u32 %s1363_s28, 4  ;;  %s1283_s1 = int_to_ptr.vmem [resolvable:$false] %s1282_s1 }
  0x99   : > { %1030 = vmatprep.subr.bf16.mxu0 %v1123_v9  ;;  %v1155_v34 = vld [vmem:[#allocation8 + $0x18] sm:$0xff]   ;;  %v1157_v36 = vld [vmem:[#allocation8 + $0x20] sm:$0xff]   ;;  %v1158_v37 = vld [vmem:[#allocation8 + $0x68] sm:$0xff]   ;;  %s1284_s30 = scalar_lea.vmem %s1283_s1, 1024  ;;  %p1285_p12 = scmp.lt.s32.totalorder %s1646_s14, %s1283_s1 }
  0x9a   : > { %564 = vmatpush1.bf16.msra.mxu1 %v1132_v14  ;;  %v943_v38 = vld [vmem:[%s1697_s2] ss:$0 sm:$0xff]  ;;  %v1159_v53 = vld [vmem:[#allocation8 + $0x28] sm:$0xff]   ;;  %v1160_v54 = vld [vmem:[#allocation8 + $0x70] sm:$0xff]   ;;  %p1280_p3 = pnand %p1279_p10, %p1557_p5  ;;  %p1286_p1 = scmp.lt.s32.totalorder %s1284_s30, %s1278_s11 }
  0x9b   : > { %565 = vmatprep.subr.bf16.mxu1 %v1133_v15  ;;  %v1161_v55 = vld [vmem:[#allocation8 + $0x30] sm:$0xff]   ;;  %v1162_v56 = vld [vmem:[#allocation8 + $0x78] sm:$0xff]   ;;  %v467_v61 = vld [vmem:[%s1699_s4] sm:$0x3] }
  0x9c   : > { %1031 = vmatpush3.bf16.msra.mxu0 %v1123_v9  ;;  %v1163_v57 = vld [vmem:[#allocation8 + $0x38] sm:$0xff]   ;;  %v472_v63 = vrot.slane %v467_v61, %v471_v60  ;;  %v476_v0 = vrot.slane %v467_v61, %v475_v62  ;;  %p1281_p7 = pneg %p1280_p3  ;;  %p1287_p2 = por %p1286_p1, %p1285_p12 }
  0x9d   : > { %996 = vmatprep.subr.bf16.mxu0 %v1148_v27 }
  0x9e   : > { %566 = vmatpush1.bf16.msra.mxu1 %v1135_v17  ;;  %p1288_p4 = pnand %p1287_p2, %p1281_p7 }
  0x9f   : > { %1033 = vmatmul.mubr.msk.bf16.vlgmr.msra.gmra.mrb[0].mxu0 %vm389_vm0, %v349_v16  ;;  %567 = vmatprep.subr.bf16.mxu1 %v1136_v18 }
  0xa0   : > { %997 = vmatpush3.bf16.msra.mxu0 %v1149_v28 }
  0xa1   : > { %998 = vmatprep.subr.bf16.mxu0 %v1150_v29 }
  0xa2   : > { %568 = vmatpush1.bf16.msra.mxu1 %v1138_v19 }
  0xa3   : > { %569 = vmatprep.subr.bf16.mxu1 %v1139_v20 }
  0xa4   : > { %999 = vmatpush3.bf16.msra.mxu0 %v1151_v30  ;;  %v966_v30 = vld [vmem:[%s1701_s6] ss:$0 sm:$0xff] }
  0xa5   : > { %1000 = vmatprep.subr.bf16.mxu0 %v1152_v31 }
  0xa6   : > { %570 = vmatpush1.bf16.msra.mxu1 %v1141_v21 }
  0xa7   : > { %571 = vmatprep.subr.bf16.mxu1 %v1142_v22 }
  0xa8   : > { %1001 = vmatpush3.bf16.msra.mxu0 %v1153_v32 }
  0xa9   : > { %1002 = vmatprep.subr.bf16.mxu0 %v1154_v33 }
  0xaa   : > { %572 = vmatpush1.bf16.msra.mxu1 %v1144_v23 }
  0xab   : > { %573 = vmatprep.subr.bf16.mxu1 %v1145_v24 }
  0xac   : > { %1003 = vmatpush3.bf16.msra.mxu0 %v1155_v34 }
  0xad   : > { %1004 = vmatprep.subr.bf16.mxu0 %v1156_v35 }
  0xae   : > { %574 = vmatpush1.bf16.msra.mxu1 %v1147_v25 }
  0xb0   : > { %1005 = vmatpush3.bf16.msra.mxu0 %v1157_v36 }
  0xb1   : > { %1006 = vmatprep.subr.bf16.mxu0 %v1158_v37 }
  0xb4   : > { %1007 = vmatpush3.bf16.msra.mxu0 %v1159_v53 }
  0xb5   : > { %1008 = vmatprep.subr.bf16.mxu0 %v1160_v54 }
  0xb8   : > { %1009 = vmatpush3.bf16.msra.mxu0 %v1161_v55 }
  0xb9   : > { %1010 = vmatprep.subr.bf16.mxu0 %v1162_v56 }
  0xbc   : > { %1011 = vmatpush3.bf16.msra.mxu0 %v1163_v57 }
 0x172   : > { %v1034_v39 = vpop.f32.mrb[0].mxu0 }
 0x173   : > { %v439_v40 = vadd.f32 %v1034_v39, %v943_v38  ;;  %v430_v41 = vpop.f32.mrb[1].mxu0 }
 0x174   : > { %v431_v42 = vadd.f32 %v943_v38, %v430_v41  ;;  %v1035_v43 = vpop.f32.mrb[2].mxu0 }
 0x175   : > { %v442_v44 = vadd.f32 %v1035_v43, %v943_v38  ;;  %v433_v45 = vpop.f32.mrb[3].mxu0  ;;  %v447_v47 = vmax.f32 %v439_v40, 0.0 }
 0x176   : > { %v434_v46 = vadd.f32 %v943_v38, %v433_v45  ;;  %v445_v49 = vmax.f32 %v431_v42, 0.0 }
 0x177   : > { %v448_v48 = vmax.f32 %v442_v44, 0.0 }
 0x178   : > { %v446_v50 = vmax.f32 %v434_v46, 0.0 }
 0x179   : > { %v450_v51 = vpack.c.bf16 %v448_v48, %v447_v47 }
 0x17a   : > { %v449_v52 = vpack.c.bf16 %v446_v50, %v445_v49 }
 0x17c   : > { %592 = vmatmul.mubr.bf16.vlgmr.msra.gmra.mrb[0].mxu1 %v449_v52 }
 0x17d   : > { %601 = vmatprep.mubr.bf16.mxu1 %v1362_v26 }
 0x184   : > { %602 = vmatmul.mubr.bf16.gmra.mrb[4].mxu1 %v450_v51 }
 0x24f   : > { %v593_v1 = vpop.f32.mrb[0].mxu1 }
 0x250   : > { %v594_v2 = vadd.f32 %v593_v1, %v472_v63  ;;  %v595_v3 = vpop.f32.mrb[1].mxu1 }
 0x251   : > { %v596_v4 = vadd.f32 %v595_v3, %v476_v0  ;;  %v597_v5 = vpop.f32.mrb[2].mxu1 }
 0x252   : > { %v598_v6 = vadd.f32 %v597_v5, %v472_v63  ;;  %v599_v7 = vpop.f32.mrb[3].mxu1  ;;  %v612_v9 = vmax.f32 %v594_v2, 0.0 }
 0x253   : > { %v600_v8 = vadd.f32 %v599_v7, %v476_v0  ;;  %v613_v11 = vmax.f32 %v596_v4, 0.0 }
 0x254   : > { %v614_v10 = vmax.f32 %v598_v6, 0.0 }
 0x255   : > { %v615_v12 = vmax.f32 %v600_v8, 0.0 }
 0x256   : > { %v620_v13 = vpack.c.bf16 %v614_v10, %v612_v9 }
 0x257   : > { %v621_v14 = vpack.c.bf16 %v615_v12, %v613_v11  ;;  %v603_v15 = vpop.f32.mrb[4].mxu1 }
 0x258   : > { %v604_v16 = vadd.f32 %v603_v15, %v472_v63  ;;  %v605_v17 = vpop.f32.mrb[5].mxu1 }
 0x259   : > { %v606_v18 = vadd.f32 %v605_v17, %v476_v0  ;;  %v607_v19 = vpop.f32.mrb[6].mxu1  ;;  %791 = vmatprep.mubr.bf16.mxu0 %v621_v14 }
 0x25a   : > { %v608_v20 = vadd.f32 %v607_v19, %v472_v63  ;;  %v609_v21 = vpop.f32.mrb[7].mxu1  ;;  %792 = vmatmul.mubr.bf16.vlgmr.msra.gmra.mrb[4].mxu0 %v620_v13  ;;  %v616_v23 = vmax.f32 %v604_v16, 0.0 }
 0x25b   : > { %v610_v22 = vadd.f32 %v609_v21, %v476_v0  ;;  %v617_v25 = vmax.f32 %v606_v18, 0.0 }
 0x25c   : > { %v618_v24 = vmax.f32 %v608_v20, 0.0 }
 0x25d   : > { %v619_v26 = vmax.f32 %v610_v22, 0.0 }
 0x25e   : > { %v622_v27 = vpack.c.bf16 %v618_v24, %v616_v23 }
 0x25f   : > { %v623_v28 = vpack.c.bf16 %v619_v26, %v617_v25 }
 0x261   : > { %799 = vmatprep.mubr.bf16.mxu0 %v623_v28 }
 0x262   : > { %800 = vmatmul.mubr.bf16.gmra.mrb[8].mxu0 %v622_v27 }
 0x32d   : > { %v1012_v29 = vpop.f32.mrb[4].mxu0 }
 0x32e   : > { %v1013_v31 = vpop.f32.mrb[5].mxu0 }
 0x32f   : > { %v1014_v32 = vadd.f32 %v1013_v31, %v1012_v29  ;;  %v1015_v33 = vpop.f32.mrb[6].mxu0 }
 0x330   : > { %v1016_v34 = vpop.f32.mrb[7].mxu0 }
 0x331   : > { %v794_v35 = vadd.f32 %v1014_v32, %v966_v30  ;;  %v1017_v36 = vadd.f32 %v1016_v34, %v1015_v33 }
 0x333   : > { %808 = vst [vmem:[%s340_s8] sm:$0xff] %v794_v35  ;;  %v797_v37 = vadd.f32 %v1017_v36, %v966_v30 }
 0x335   : > { %809 = vst [vmem:[%s340_s8 + $0x8] sm:$0xff] %v797_v37  ;;  %v1018_v38 = vpop.f32.mrb[8].mxu0 }
 0x336   : > { %v1019_v39 = vpop.f32.mrb[9].mxu0 }
 0x337   : > { %v1020_v40 = vadd.f32 %v1019_v39, %v1018_v38  ;;  %v1021_v41 = vpop.f32.mrb[10].mxu0 }
 0x338   : > { %v1022_v42 = vpop.f32.mrb[11].mxu0 }
 0x339   : > { %v802_v43 = vadd.f32 %v1020_v40, %v966_v30  ;;  %v1023_v44 = vadd.f32 %v1022_v42, %v1021_v41 }
 0x33b   : > { %810 = vst [vmem:[%s340_s8 + $0x10] sm:$0xff] %v802_v43  ;;  %v805_v45 = vadd.f32 %v1023_v44, %v966_v30 }
 0x33d   : > { %811 = vst [vmem:[%s340_s8 + $0x18] sm:$0xff] %v805_v45 }
 0x33e   : > { %1291 = shalt.err (!%p1288_p4)
}
 0x33f   : > { %s1292_s9 = scalar_lea.hbm %s1651_s22, 512  ;;  %s1296_s19 = scalar_lea.hbm %s1702_s7, 1024 }
 0x340   : > { %p1293_p9 = scmp.ne.s32.totalorder %s1651_s22, %s1292_s9  ;;  %p1297_p8 = scmp.lt.u32.totalorder %s1651_s22, %s1702_s7 }
 0x341   : > { %p1298_p13 = scmp.lt.u32.totalorder %s1296_s19, %s1292_s9  ;;  %p1300_p10 = scmp.lt.u32.totalorder %s1292_s9, %s1651_s22 }
 0x342   : > { %p1294_p0 = pnand %p1293_p9, %p1557_p5 }
 0x343   : > { %p1299_p6 = por %p1298_p13, %p1297_p8 }
 0x344   : > { %p1295_p11 = pneg %p1294_p0 }
 0x345   : > { %p1301_p3 = por %p1300_p10, %p1299_p6 }
 0x347   : > { %p1302_p7 = pnand %p1301_p3, %p1295_p11 }
 0x349   : > { %1305 = shalt.err (!%p1302_p7)
}
 0x34a   : > { %s1364_s18 = smov 128   ;;  %s1365_s29 = smov 8  }
 0x34b   : > { %1050 = dma.vmem_to_hbm [thread:$0]  (%p1557_p5), %s1646_s14, 512, %s1651_s22, %s813_s23, %s1364_s18, %s1364_s18, %s1365_s29  }
 0x34c PF: > { %s1728_s12 = sld [smem:[#allocation15_spill]]  ;;  %s841_s11 = sand.u32 1, %s1340_s24  }
 0x34d   : > { %p1730_p1 = scmp.ge.s32.totalorder %s1352_s27, 2  ;;  %s842_s28 = scalar_lea.sflag [#allocation4], %s841_s11 }
 0x352   : > { %p1729_p12 = scmp.ne.s32.totalorder %s1728_s12, 0 }
 0x354   : > { %p1067_p2 = pnand %p1730_p1, %p1729_p12 }
 0x356   : > { %1335 = dma.done.wait (!%p1067_p2), %s842_s28, 512  }
 0x357   : > { %1337 = vsyncadd (!%p1067_p2), %s842_s28, 4294966784  ;;  %p22_p4 = scmp.ge.s32.totalorder %s1522_s21, 4   ;;  %s1731_s24 = smov %s1344_s25 }
 0x358   : > { %s1732_s25 = smov %s1348_s26  ;;  %s1733_s26 = smov %s1553_s16 }
 0x359   : > { %s1734_s27 = smov %s1522_s21  ;;  %24 = sbr.rel (!%p22_p4) target bundleno = 9 (0x9), region = 105 }
 0x360   :  { %847 = vsyncpa [#allocation3], 1 }
 0x361   :  { %849 = vsyncpa [#allocation3 + $0x1], 1 }
 0x362   :  { %850 = vsyncpa [#allocation6], 1 }
 0x363   :  { %851 = vsyncpa [#allocation9], 1 }
 0x364   :  { %852 = vsyncpa [#allocation4], 1 }
 0x365   :  { %854 = vsyncpa [#allocation4 + $0x1], 1 }

</bundles_post_ra>
